<compile_context>
chip_gen: v5e
topology: v5e:2x2
jax: 0.10.0
libtpu: 0.0.40
codegen_flags: <defaults>
</compile_context>

<pallas_src>
import functools
import math

import jax
import jax.numpy as jnp
from jax import lax
from jax.experimental import pallas as pl
from jax.experimental.pallas import tpu as pltpu

BN_EPS = 1e-5  # nn.BatchNorm2d default eps


def _conv_bn_relu_kernel(x_ref, w_ref, bias_ref, gamma_ref, beta_ref,
                         mask_ref, gsum_ref, gbc_ref, o_ref, *, n_valid):
    """Fused Conv2d(KHxKW, stride 1, padding 0, bias) + BatchNorm2d(train) + ReLU.

    Layouts (lane axis last):
      x_ref    : (B*H, W*Cin)          input rows on sublanes, (w, cin) cin-minor on lanes
      w_ref    : (KH, W*Cin, Wo*Cout)  lowered ("Toeplitz") conv weights, one GEMM per dh
      bias_ref : (1, Wo*Cout)          conv bias tiled per output lane
      gamma_ref, beta_ref : (1, Cout)
      mask_ref : (R_out, 1)            1.0 for rows that are real conv outputs
      gsum_ref : (Wo*Cout, Cout)       lane -> channel pooling matrix
      gbc_ref  : (Cout, Wo*Cout)       channel -> lane broadcast matrix
      o_ref    : (R_out, Wo*Cout)      R_out = B*H - (KH-1); garbage rows dropped by wrapper
    """
    kh = w_ref.shape[0]
    r_out = o_ref.shape[0]

    # ---- Conv as KH lane-dense GEMMs on the MXU: K = W*Cin, N = Wo*Cout. ----
    acc = jnp.dot(x_ref[0:r_out, :], w_ref[0], preferred_element_type=jnp.float32)
    for dh in range(1, kh):                                   # static loop, KH = 3
        acc = acc + jnp.dot(x_ref[dh:dh + r_out, :], w_ref[dh],
                            preferred_element_type=jnp.float32)
    acc = acc + bias_ref[...]                                 # conv bias (row broadcast)

    # ---- BatchNorm2d (training-mode batch stats), single fused pass E[x], E[x^2]. ----
    valid = acc * mask_ref[...]              # zero rows straddling a batch boundary
    sum1 = jnp.sum(valid, axis=0, keepdims=True)              # (1, Wo*Cout)
    sum2 = jnp.sum(valid * valid, axis=0, keepdims=True)      # (1, Wo*Cout)
    inv_n = jnp.float32(1.0 / n_valid)
    mean = jnp.dot(sum1, gsum_ref[...], preferred_element_type=jnp.float32) * inv_n  # (1, Cout)
    msq = jnp.dot(sum2, gsum_ref[...], preferred_element_type=jnp.float32) * inv_n   # (1, Cout)
    var = msq - mean * mean                  # biased variance (PyTorch train-mode norm)
    inv_std = lax.rsqrt(var + BN_EPS)        # EUP rsqrt -- no VPU divide
    scale = gamma_ref[...] * inv_std                          # (1, Cout)
    shift = beta_ref[...] - mean * scale                      # (1, Cout)
    scale_l = jnp.dot(scale, gbc_ref[...], preferred_element_type=jnp.float32)  # (1, Wo*Cout)
    shift_l = jnp.dot(shift, gbc_ref[...], preferred_element_type=jnp.float32)

    # ---- ReLU + lane-dense store. ----
    o_ref[...] = jnp.maximum(acc * scale_l + shift_l, 0.0)


@jax.jit
def conv_bn_relu(x, weight, bias, gamma, beta):
    """x: (B, Cin, H, W) f32; weight: (Cout, Cin, KH, KW); stride 1, padding 0.

    Returns ReLU(BatchNorm2d(Conv2d(x))) as (B, Cout, Ho, Wo); BN in training mode.
    """
    B, Cin, H, W = x.shape
    Cout, _, KH, KW = weight.shape
    Ho, Wo = H - KH + 1, W - KW + 1
    r_in, r_out = B * H, B * H - (KH - 1)
    n_valid = B * Ho * Wo
    f32 = jnp.float32

    # NCHW -> (B*H, W*Cin): rows on sublanes, (w, cin) cin-minor on lanes.
    x2 = jnp.transpose(x, (0, 2, 3, 1)).reshape(r_in, W * Cin).astype(f32)

    # Lowered conv weights: BigW[dh, w*Cin+c, wo*Cout+o] = weight[o, c, dh, w-wo]
    # when 0 <= w - wo < KW, else 0.  One (W*Cin, Wo*Cout) GEMM operand per kernel row.
    wt = jnp.transpose(weight, (2, 3, 1, 0)).astype(f32)            # (KH, KW, Cin, Cout)
    dwm = jnp.arange(W)[:, None] - jnp.arange(Wo)[None, :]          # (W, Wo): w - wo
    in_band = (dwm >= 0) & (dwm < KW)
    bigw = wt[:, jnp.clip(dwm, 0, KW - 1)]                          # (KH, W, Wo, Cin, Cout)
    bigw = jnp.where(in_band[None, :, :, None, None], bigw, 0.0)
    bigw = jnp.transpose(bigw, (0, 1, 3, 2, 4)).reshape(KH, W * Cin, Wo * Cout)

    bias_l = jnp.tile(bias.astype(f32).reshape(1, Cout), (1, Wo))   # (1, Wo*Cout)

    # Rows of the batch-folded image whose KHxKW window straddles a batch boundary.
    mask = (jnp.arange(r_out) % H < Ho).astype(f32).reshape(r_out, 1)

    # Lane <-> channel reduction / broadcast selector matrices (lane = wo*Cout + o).
    lane_ch = jnp.tile(jnp.arange(Cout), Wo)                              # (Wo*Cout,)
    gsum = (lane_ch[:, None] == jnp.arange(Cout)[None, :]).astype(f32)    # (Wo*Cout, Cout)
    gbc = jnp.transpose(gsum)                                             # (Cout, Wo*Cout)

    vmem = pl.BlockSpec(memory_space=pltpu.MemorySpace.VMEM)
    out_flat = pl.pallas_call(
        functools.partial(_conv_bn_relu_kernel, n_valid=n_valid),
        out_shape=jax.ShapeDtypeStruct((r_out, Wo * Cout), f32),
        in_specs=[vmem] * 8,
        out_specs=vmem,
    )(x2, bigw, bias_l,
      gamma.astype(f32).reshape(1, Cout), beta.astype(f32).reshape(1, Cout),
      mask, gsum, gbc)

    # Drop the (B-1)*(KH-1) cross-batch rows and restore NCHW.
    rows = (jnp.arange(B)[:, None] * H + jnp.arange(Ho)[None, :]).reshape(-1)
    out = out_flat[rows].reshape(B, Ho, Wo, Cout)
    return jnp.transpose(out, (0, 3, 1, 2))


def _reference(x, weight, bias, gamma, beta):
    """Pure-JAX reference: Conv2d(valid, bias) + train-mode BatchNorm2d + ReLU."""
    z = lax.conv_general_dilated(x, weight, window_strides=(1, 1), padding="VALID",
                                 dimension_numbers=("NCHW", "OIHW", "NCHW"))
    z = z + bias.reshape(1, -1, 1, 1)
    mean = jnp.mean(z, axis=(0, 2, 3), keepdims=True)
    var = jnp.mean(jnp.square(z - mean), axis=(0, 2, 3), keepdims=True)
    zn = (z - mean) * lax.rsqrt(var + BN_EPS)
    return jnp.maximum(zn * gamma.reshape(1, -1, 1, 1) + beta.reshape(1, -1, 1, 1), 0.0)


if __name__ == "__main__":
    key = jax.random.PRNGKey(0)
    B, Cin, Cout, H, W, K = 2, 4, 8, 16, 16, 3

    kx, kw, kb, kg, kbe = jax.random.split(key, 5)
    x = jax.random.normal(kx, (B, Cin, H, W), jnp.float32)
    weight = jax.random.normal(kw, (Cout, Cin, K, K), jnp.float32) / math.sqrt(Cin * K * K)
    bias = 0.1 * jax.random.normal(kb, (Cout,), jnp.float32)
    gamma = 1.0 + 0.1 * jax.random.normal(kg, (Cout,), jnp.float32)
    beta = 0.1 * jax.random.normal(kbe, (Cout,), jnp.float32)

    out = conv_bn_relu(x, weight, bias, gamma, beta)
    jax.block_until_ready(out)

    assert out.shape == (B, Cout, H - K + 1, W - K + 1) and out.dtype == jnp.float32

    ref = _reference(x, weight, bias, gamma, beta)
    max_err = float(jnp.max(jnp.abs(out - ref)))
    assert max_err < 2e-4, f"max abs error vs reference: {max_err}"
    print("KERNEL_OK")
</pallas_src>

<mosaic_0001>
module attributes {stable_mosaic.version = 11 : i64} {
  func.func @_conv_bn_relu_kernel(%arg0: memref<32x64xf32, #tpu.memory_space<vmem>>, %arg1: memref<3x64x112xf32, #tpu.memory_space<vmem>>, %arg2: memref<1x112xf32, #tpu.memory_space<vmem>>, %arg3: memref<1x8xf32, #tpu.memory_space<vmem>>, %arg4: memref<1x8xf32, #tpu.memory_space<vmem>>, %arg5: memref<30x1xf32, #tpu.memory_space<vmem>>, %arg6: memref<112x8xf32, #tpu.memory_space<vmem>>, %arg7: memref<8x112xf32, #tpu.memory_space<vmem>>, %arg8: memref<30x112xf32, #tpu.memory_space<vmem>>) attributes {dimension_semantics = [], scalar_prefetch = 0 : i64, scratch_operands = 0 : i64, tpu.core_type = #tpu.core_type<tc>} {
    %c0 = arith.constant 0 : index
    %c0_0 = arith.constant 0 : index
    %0 = vector.load %arg0[%c0, %c0_0] : memref<32x64xf32, #tpu.memory_space<vmem>>, vector<30x64xf32>
    %c0_1 = arith.constant 0 : index
    %c0_2 = arith.constant 0 : index
    %c0_3 = arith.constant 0 : index
    %1 = vector.load %arg1[%c0_1, %c0_2, %c0_3] : memref<3x64x112xf32, #tpu.memory_space<vmem>>, vector<1x64x112xf32>
    %2 = vector.shape_cast %1 : vector<1x64x112xf32> to vector<64x112xf32>
    %cst = arith.constant dense<0.000000e+00> : vector<30x112xf32>
    %3 = tpu.matmul %0, %2, %cst {dimension_numbers = #tpu.dot_dimension_numbers<[1], [0], [0], [1], [0, 0, 1, 1], [], []>} : vector<30x64xf32>, vector<64x112xf32>, vector<30x112xf32> -> vector<30x112xf32>
    %c1 = arith.constant 1 : index
    %c0_4 = arith.constant 0 : index
    %4 = vector.load %arg0[%c1, %c0_4] : memref<32x64xf32, #tpu.memory_space<vmem>>, vector<30x64xf32>
    %c1_5 = arith.constant 1 : index
    %c0_6 = arith.constant 0 : index
    %c0_7 = arith.constant 0 : index
    %5 = vector.load %arg1[%c1_5, %c0_6, %c0_7] : memref<3x64x112xf32, #tpu.memory_space<vmem>>, vector<1x64x112xf32>
    %6 = vector.shape_cast %5 : vector<1x64x112xf32> to vector<64x112xf32>
    %cst_8 = arith.constant dense<0.000000e+00> : vector<30x112xf32>
    %7 = tpu.matmul %4, %6, %cst_8 {dimension_numbers = #tpu.dot_dimension_numbers<[1], [0], [0], [1], [0, 0, 1, 1], [], []>} : vector<30x64xf32>, vector<64x112xf32>, vector<30x112xf32> -> vector<30x112xf32>
    %8 = arith.addf %3, %7 : vector<30x112xf32>
    %c2 = arith.constant 2 : index
    %c0_9 = arith.constant 0 : index
    %9 = vector.load %arg0[%c2, %c0_9] : memref<32x64xf32, #tpu.memory_space<vmem>>, vector<30x64xf32>
    %c2_10 = arith.constant 2 : index
    %c0_11 = arith.constant 0 : index
    %c0_12 = arith.constant 0 : index
    %10 = vector.load %arg1[%c2_10, %c0_11, %c0_12] : memref<3x64x112xf32, #tpu.memory_space<vmem>>, vector<1x64x112xf32>
    %11 = vector.shape_cast %10 : vector<1x64x112xf32> to vector<64x112xf32>
    %cst_13 = arith.constant dense<0.000000e+00> : vector<30x112xf32>
    %12 = tpu.matmul %9, %11, %cst_13 {dimension_numbers = #tpu.dot_dimension_numbers<[1], [0], [0], [1], [0, 0, 1, 1], [], []>} : vector<30x64xf32>, vector<64x112xf32>, vector<30x112xf32> -> vector<30x112xf32>
    %13 = arith.addf %8, %12 : vector<30x112xf32>
    %c0_14 = arith.constant 0 : index
    %c0_15 = arith.constant 0 : index
    %14 = vector.load %arg2[%c0_14, %c0_15] : memref<1x112xf32, #tpu.memory_space<vmem>>, vector<1x112xf32>
    %15 = vector.broadcast %14 : vector<1x112xf32> to vector<30x112xf32>
    %16 = arith.addf %13, %15 : vector<30x112xf32>
    %c0_16 = arith.constant 0 : index
    %c0_17 = arith.constant 0 : index
    %17 = vector.load %arg5[%c0_16, %c0_17] : memref<30x1xf32, #tpu.memory_space<vmem>>, vector<30x1xf32>
    %18 = vector.broadcast %17 : vector<30x1xf32> to vector<30x112xf32>
    %19 = arith.mulf %16, %18 : vector<30x112xf32>
    %cst_18 = arith.constant dense<0.000000e+00> : vector<112xf32>
    %20 = vector.multi_reduction <add>, %19, %cst_18 [0] : vector<30x112xf32> to vector<112xf32>
    %21 = vector.shape_cast %20 : vector<112xf32> to vector<1x112xf32>
    %22 = arith.mulf %19, %19 : vector<30x112xf32>
    %cst_19 = arith.constant dense<0.000000e+00> : vector<112xf32>
    %23 = vector.multi_reduction <add>, %22, %cst_19 [0] : vector<30x112xf32> to vector<112xf32>
    %24 = vector.shape_cast %23 : vector<112xf32> to vector<1x112xf32>
    %c0_20 = arith.constant 0 : index
    %c0_21 = arith.constant 0 : index
    %25 = vector.load %arg6[%c0_20, %c0_21] : memref<112x8xf32, #tpu.memory_space<vmem>>, vector<112x8xf32>
    %cst_22 = arith.constant dense<0.000000e+00> : vector<1x8xf32>
    %26 = tpu.matmul %21, %25, %cst_22 {dimension_numbers = #tpu.dot_dimension_numbers<[1], [0], [0], [1], [0, 0, 1, 1], [], []>} : vector<1x112xf32>, vector<112x8xf32>, vector<1x8xf32> -> vector<1x8xf32>
    %cst_23 = arith.constant 0.00255102036 : f32
    %27 = vector.broadcast %cst_23 : f32 to vector<1x8xf32>
    %28 = arith.mulf %26, %27 : vector<1x8xf32>
    %c0_24 = arith.constant 0 : index
    %c0_25 = arith.constant 0 : index
    %29 = vector.load %arg6[%c0_24, %c0_25] : memref<112x8xf32, #tpu.memory_space<vmem>>, vector<112x8xf32>
    %cst_26 = arith.constant dense<0.000000e+00> : vector<1x8xf32>
    %30 = tpu.matmul %24, %29, %cst_26 {dimension_numbers = #tpu.dot_dimension_numbers<[1], [0], [0], [1], [0, 0, 1, 1], [], []>} : vector<1x112xf32>, vector<112x8xf32>, vector<1x8xf32> -> vector<1x8xf32>
    %cst_27 = arith.constant 0.00255102036 : f32
    %31 = vector.broadcast %cst_27 : f32 to vector<1x8xf32>
    %32 = arith.mulf %30, %31 : vector<1x8xf32>
    %33 = arith.mulf %28, %28 : vector<1x8xf32>
    %34 = arith.subf %32, %33 : vector<1x8xf32>
    %cst_28 = arith.constant 9.99999974E-6 : f32
    %35 = vector.broadcast %cst_28 : f32 to vector<1x8xf32>
    %36 = arith.addf %34, %35 : vector<1x8xf32>
    %37 = math.rsqrt %36 : vector<1x8xf32>
    %c0_29 = arith.constant 0 : index
    %c0_30 = arith.constant 0 : index
    %38 = vector.load %arg3[%c0_29, %c0_30] : memref<1x8xf32, #tpu.memory_space<vmem>>, vector<1x8xf32>
    %39 = arith.mulf %38, %37 : vector<1x8xf32>
    %c0_31 = arith.constant 0 : index
    %c0_32 = arith.constant 0 : index
    %40 = vector.load %arg4[%c0_31, %c0_32] : memref<1x8xf32, #tpu.memory_space<vmem>>, vector<1x8xf32>
    %41 = arith.mulf %28, %39 : vector<1x8xf32>
    %42 = arith.subf %40, %41 : vector<1x8xf32>
    %c0_33 = arith.constant 0 : index
    %c0_34 = arith.constant 0 : index
    %43 = vector.load %arg7[%c0_33, %c0_34] : memref<8x112xf32, #tpu.memory_space<vmem>>, vector<8x112xf32>
    %cst_35 = arith.constant dense<0.000000e+00> : vector<1x112xf32>
    %44 = tpu.matmul %39, %43, %cst_35 {dimension_numbers = #tpu.dot_dimension_numbers<[1], [0], [0], [1], [0, 0, 1, 1], [], []>} : vector<1x8xf32>, vector<8x112xf32>, vector<1x112xf32> -> vector<1x112xf32>
    %c0_36 = arith.constant 0 : index
    %c0_37 = arith.constant 0 : index
    %45 = vector.load %arg7[%c0_36, %c0_37] : memref<8x112xf32, #tpu.memory_space<vmem>>, vector<8x112xf32>
    %cst_38 = arith.constant dense<0.000000e+00> : vector<1x112xf32>
    %46 = tpu.matmul %42, %45, %cst_38 {dimension_numbers = #tpu.dot_dimension_numbers<[1], [0], [0], [1], [0, 0, 1, 1], [], []>} : vector<1x8xf32>, vector<8x112xf32>, vector<1x112xf32> -> vector<1x112xf32>
    %47 = vector.broadcast %44 : vector<1x112xf32> to vector<30x112xf32>
    %48 = arith.mulf %16, %47 : vector<30x112xf32>
    %49 = vector.broadcast %46 : vector<1x112xf32> to vector<30x112xf32>
    %50 = arith.addf %48, %49 : vector<30x112xf32>
    %cst_39 = arith.constant 0.000000e+00 : f32
    %51 = vector.broadcast %cst_39 : f32 to vector<30x112xf32>
    %52 = arith.maximumf %50, %51 : vector<30x112xf32>
    %c0_40 = arith.constant 0 : index
    %c0_41 = arith.constant 0 : index
    %53 = vector.load %arg8[%c0_40, %c0_41] : memref<30x112xf32, #tpu.memory_space<vmem>>, vector<30x112xf32>
    tpu.vector_store %arg8[%c0_40, %c0_41], %52 {strides = array<i32>} : memref<30x112xf32, #tpu.memory_space<vmem>>, vector<30x112xf32>,
    return
  }
}

</mosaic_0001>

<bundles_post_ra>
// kernel: eq.10
= control target key start
LH: loop header
LB: loop body
LE: loop exit
PB: predicated region body
PF: predicated region fallthrough
CT: control target
= control target key end

     0   :  { %s115_s10 = smov 104   ;;  %s116_s11 = smov 88   ;;  %vm3_vm0 = vcmask 64512   ;;  %vm9_vm1 = vcmask 917312   ;;  %vm15_vm2 = vcmask 851712   ;;  %vm21_vm3 = vcmask 786112   ;;  %s183_s0 = inlined_call_operand.vmem [shape: s32[14,8], index: 0, kind: input, shape index: {}]   ;;  %s184_s1 = inlined_call_operand.vmem [shape: s32[112], index: 1, kind: output, shape index: {}]  }
   0x1   :  { %v89_v0 = vld [vmem:[%s183_s0 + $0xd] sm:$0x1]   ;;  %v91_v1 = vld [vmem:[%s183_s0 + $0xb] sm:$0x1]   ;;  %v93_v2 = vld [vmem:[%s183_s0 + $0x9] sm:$0x1]  }
   0x2   :  { %7 = vrot.lane.b32.xlu0 %v89_v0, %s115_s10  ;;  %19 = vrot.lane.b32.xlu1 %v91_v1, %s116_s11  ;;  %s117_s14 = smov 72   ;;  %v90_v3 = vld [vmem:[%s183_s0 + $0xc] sm:$0x1]   ;;  %v92_v4 = vld [vmem:[%s183_s0 + $0xa] sm:$0x1]   ;;  %s118_s19 = smov 96  }
   0x3   :  { %31 = vrot.lane.b32.xlu2 %v93_v2, %s117_s14  ;;  %s119_s20 = smov 80   ;;  %v94_v5 = vld [vmem:[%s183_s0 + $0x8] sm:$0x1]   ;;  %s120_s23 = smov 64   ;;  %v95_v6 = vld [vmem:[%s183_s0 + $0x7] sm:$0x1]  }
   0x4   :  { %v96_v7 = vld [vmem:[%s183_s0 + $0x6] sm:$0x1]   ;;  %s121_s28 = smov 56   ;;  %s122_s29 = smov 48   ;;  %v97_v8 = vld [vmem:[%s183_s0 + $0x5] sm:$0x1]  }
   0x5   :  { %s123_s3 = smov 40   ;;  %v98_v9 = vld [vmem:[%s183_s0 + $0x4] sm:$0x1]   ;;  %v99_v10 = vld [vmem:[%s183_s0 + $0x3] sm:$0x1]   ;;  %s124_s8 = smov 32  }
   0x6   :  { %s125_s9 = smov 24   ;;  %v100_v11 = vld [vmem:[%s183_s0 + $0x2] sm:$0x1]   ;;  %s126_s12 = smov 16   ;;  %v101_v12 = vld [vmem:[%s183_s0 + $0x1] sm:$0x1]  }
   0x7   :  { %s127_s15 = smov 8   ;;  %v2_v13 = vld [vmem:[%s183_s0] sm:$0x1]   ;;  %vm27_vm4 = vcmask 720512   ;;  %vm33_vm5 = vcmask 654912   ;;  %vm39_vm6 = vcmask 589312  }
   0x8   :  { %4 = vst.msk [vmem:[#allocation0] sm:$0x1] %vm3_vm0, %v2_v13   ;;  %vm45_vm7 = vcmask 523712   ;;  %vm51_vm8 = vcmask 458112   ;;  %vm57_vm9 = vcmask 392512   ;;  %vm63_vm10 = vcmask 326912  }
   0x9   :  { %vm69_vm11 = vcmask 261312   ;;  %vm75_vm12 = vcmask 195712   ;;  %vm81_vm13 = vcmask 130112  }
   0xa   :  { %13 = vrot.lane.b32.xlu0 %v90_v3, %s118_s19  ;;  %25 = vrot.lane.b32.xlu1 %v92_v4, %s119_s20 }
   0xb   :  { %37 = vrot.lane.b32.xlu2 %v94_v5, %s120_s23 }
  0x12   :  { %43 = vrot.lane.b32.xlu0 %v95_v6, %s121_s28  ;;  %49 = vrot.lane.b32.xlu1 %v96_v7, %s122_s29 }
  0x13   :  { %55 = vrot.lane.b32.xlu2 %v97_v8, %s123_s3 }
  0x1a   :  { %61 = vrot.lane.b32.xlu0 %v98_v9, %s124_s8  ;;  %67 = vrot.lane.b32.xlu1 %v99_v10, %s125_s9 }
  0x1b   :  { %73 = vrot.lane.b32.xlu2 %v100_v11, %s126_s12 }
  0x22   :  { %79 = vrot.lane.b32.xlu0 %v101_v12, %s127_s15 }
  0x5d   :  { %v32_v14 = vpop.permute.xlu2 %31  }
  0x65   :  { %v38_v15 = vpop.permute.xlu2 %37  }
  0x6d   :  { %v56_v16 = vpop.permute.xlu2 %55  }
  0x74   :  { %v8_v17 = vpop.permute.xlu0 %7   ;;  %v20_v18 = vpop.permute.xlu1 %19  }
  0x75   :  { %10 = vst.msk [vmem:[#allocation0] sm:$0x1] %vm9_vm1, %v8_v17   ;;  %v74_v19 = vpop.permute.xlu2 %73  }
  0x7c   :  { %v14_v20 = vpop.permute.xlu0 %13   ;;  %v26_v21 = vpop.permute.xlu1 %25  }
  0x7d   :  { %16 = vst.msk [vmem:[#allocation0] sm:$0x1] %vm15_vm2, %v14_v20  }
  0x7e   :  { %22 = vst.msk [vmem:[#allocation0] sm:$0x1] %vm21_vm3, %v20_v18  }
  0x7f   :  { %28 = vst.msk [vmem:[#allocation0] sm:$0x1] %vm27_vm4, %v26_v21  }
  0x80   :  { %34 = vst.msk [vmem:[#allocation0] sm:$0x1] %vm33_vm5, %v32_v14  }
  0x81   :  { %40 = vst.msk [vmem:[#allocation0] sm:$0x1] %vm39_vm6, %v38_v15  }
  0x84   :  { %v44_v22 = vpop.permute.xlu0 %43   ;;  %v50_v23 = vpop.permute.xlu1 %49  }
  0x85   :  { %46 = vst.msk [vmem:[#allocation0] sm:$0x1] %vm45_vm7, %v44_v22  }
  0x86   :  { %52 = vst.msk [vmem:[#allocation0] sm:$0x1] %vm51_vm8, %v50_v23  }
  0x87   :  { %58 = vst.msk [vmem:[#allocation0] sm:$0x1] %vm57_vm9, %v56_v16  }
  0x8c   :  { %v62_v24 = vpop.permute.xlu0 %61   ;;  %v68_v25 = vpop.permute.xlu1 %67  }
  0x8d   :  { %64 = vst.msk [vmem:[#allocation0] sm:$0x1] %vm63_vm10, %v62_v24  }
  0x8e   :  { %70 = vst.msk [vmem:[#allocation0] sm:$0x1] %vm69_vm11, %v68_v25  }
  0x8f   :  { %76 = vst.msk [vmem:[#allocation0] sm:$0x1] %vm75_vm12, %v74_v19  }
  0x94   :  { %v80_v26 = vpop.permute.xlu0 %79  }
  0x95   :  { %82 = vst.msk [vmem:[#allocation0] sm:$0x1] %vm81_vm13, %v80_v26  }
  0x9c   :  { %v85_v27 = vld [vmem:[#allocation0] sm:$0x1] }
  0x9d   :  { %88 = vst [vmem:[%s184_s1] sm:$0x1] %v85_v27 }

// kernel: conv_bn_relu.1
= control target key start
LH: loop header
LB: loop body
LE: loop exit
PB: predicated region body
PF: predicated region fallthrough
CT: control target
= control target key end

     0   :  { %v451_v8 = vmov 0   ;;  %vm54_vm0 = vcmask 523264   ;;  %vm231_vm1 = vcmask 916480   ;;  %vm237_vm2 = vcmask 914432   ;;  %s725_s1 = inlined_call_operand.vmem [shape: f32[3,64,112], index: 1, kind: input, shape index: {}]   ;;  %s726_s5 = inlined_call_operand.vmem [shape: f32[30,1], index: 5, kind: input, shape index: {}]   ;;  %s727_s0 = inlined_call_operand.vmem [shape: f32[32,64], index: 0, kind: input, shape index: {}]   ;;  %s728_s2 = inlined_call_operand.vmem [shape: f32[1,112], index: 2, kind: input, shape index: {}]   ;;  %s729_s6 = inlined_call_operand.vmem [shape: f32[112,8], index: 6, kind: input, shape index: {}]   ;;  %s730_s7 = inlined_call_operand.vmem [shape: f32[8,112], index: 7, kind: input, shape index: {}]   ;;  %s731_s3 = inlined_call_operand.vmem [shape: f32[1,8], index: 3, kind: input, shape index: {}]   ;;  %s732_s4 = inlined_call_operand.vmem [shape: f32[1,8], index: 4, kind: input, shape index: {}]   ;;  %s733_s8 = inlined_call_operand.vmem [shape: f32[30,112], index: 8, kind: output, shape index: {}]  }
   0x1   :  { %v436_v0 = vld [vmem:[%s725_s1 + $0xb8] sm:$0xff]  ;;  %v435_v1 = vld [vmem:[%s725_s1 + $0xb0] sm:$0xff]  ;;  %v434_v5 = vld [vmem:[%s725_s1 + $0xa8] sm:$0xff]  ;;  %446 = vset.pattern.permute.xlu0 %v451_v8  ;;  %447 = vset.pattern.permute.xlu1 %v451_v8  ;;  %vm344_vm6 = vcmask 64512  }
   0x2   :  { %v420_v2 = vld [vmem:[%s725_s1 + $0x78] sm:$0xff]  ;;  %170 = vmatpush.msra.mxu2 %v436_v0  ;;  %v419_v4 = vld [vmem:[%s725_s1 + $0x70] sm:$0xff]  ;;  %v418_v7 = vld [vmem:[%s725_s1 + $0x68] sm:$0xff] }
   0x3   :  { %75 = vmatpush.msra.mxu0 %v420_v2  ;;  %v40_v3 = vld [vmem:[%s725_s1 + $0x38] sm:$0xff]  ;;  %v39_v6 = vld [vmem:[%s725_s1 + $0x30] sm:$0xff]  ;;  %v38_v9 = vld [vmem:[%s725_s1 + $0x28] sm:$0xff] }
   0x4   :  { %116 = vmatpush.msra.mxu1 %v40_v3  ;;  %171 = vmatpush.msra.mxu2 %v435_v1  ;;  %v433_v10 = vld [vmem:[%s725_s1 + $0xa0] sm:$0xff]  ;;  %v432_v13 = vld [vmem:[%s725_s1 + $0x98] sm:$0xff]  ;;  %v431_v16 = vld [vmem:[%s725_s1 + $0x90] sm:$0xff] }
   0x5   :  { %76 = vmatpush.msra.mxu0 %v419_v4  ;;  %v417_v11 = vld [vmem:[%s725_s1 + $0x60] sm:$0xff]  ;;  %v416_v14 = vld [vmem:[%s725_s1 + $0x58] sm:$0xff]  ;;  %v415_v17 = vld [vmem:[%s725_s1 + $0x50] sm:$0xff] }
   0x6   :  { %117 = vmatpush.msra.mxu1 %v39_v6  ;;  %172 = vmatpush.msra.mxu2 %v434_v5  ;;  %v37_v12 = vld [vmem:[%s725_s1 + $0x20] sm:$0xff]  ;;  %v36_v15 = vld [vmem:[%s725_s1 + $0x18] sm:$0xff]  ;;  %v35_v18 = vld [vmem:[%s725_s1 + $0x10] sm:$0xff] }
   0x7   :  { %77 = vmatpush.msra.mxu0 %v418_v7  ;;  %v430_v19 = vld [vmem:[%s725_s1 + $0x88] sm:$0xff]  ;;  %v203_v22 = vld [vmem:[%s726_s5] sm:$0xff]  ;;  %v205_v25 = vld [vmem:[%s726_s5 + $0x10] sm:$0xff] }
   0x8   :  { %118 = vmatpush.msra.mxu1 %v38_v9  ;;  %173 = vmatpush.msra.mxu2 %v433_v10  ;;  %v414_v20 = vld [vmem:[%s725_s1 + $0x48] sm:$0xff]  ;;  %v429_v23 = vld [vmem:[%s725_s1 + $0x80] sm:$0xff]  ;;  %v206_v31 = vld [vmem:[%s726_s5 + $0x18] sm:$0x3f] }
   0x9   :  { %78 = vmatpush.msra.mxu0 %v417_v11  ;;  %v34_v21 = vld [vmem:[%s725_s1 + $0x8] sm:$0xff]  ;;  %v413_v24 = vld [vmem:[%s725_s1 + $0x40] sm:$0xff]  ;;  %209 = vperm.xlu0 %446, %v203_v22   ;;  %v139_v35 = vld [vmem:[%s727_s0 + $0x12] sm:$0xff] }
   0xa   :  { %119 = vmatpush.msra.mxu1 %v37_v12  ;;  %174 = vmatpush.msra.mxu2 %v432_v13  ;;  %v137_v26 = vld [vmem:[%s727_s0 + $0x2] sm:$0xff]  ;;  %v138_v32 = vld [vmem:[%s727_s0 + $0xa] sm:$0xff]  ;;  %v140_v38 = vld [vmem:[%s727_s0 + $0x1a] sm:$0x3f] }
   0xb   :  { %79 = vmatpush.msra.mxu0 %v416_v14  ;;  %v33_v27 = vld [vmem:[%s725_s1] sm:$0xff]  ;;  %219 = vperm.xlu1 %447, %v205_v25   ;;  %v204_v30 = vld [vmem:[%s726_s5 + $0x8] sm:$0xff]  ;;  %v43_v36 = vld [vmem:[%s727_s0 + $0x11] sm:$0xff] }
   0xc   :  { %120 = vmatpush.msra.mxu1 %v36_v15  ;;  %175 = vmatpush.msra.mxu2 %v431_v16  ;;  %v41_v28 = vld [vmem:[%s727_s0 + $0x1] sm:$0xff]  ;;  %v42_v33 = vld [vmem:[%s727_s0 + $0x9] sm:$0xff]  ;;  %v44_v39 = vld [vmem:[%s727_s0 + $0x19] sm:$0x3f] }
   0xd   :  { %80 = vmatpush.msra.mxu0 %v415_v17  ;;  %v29_v29 = vld [vmem:[%s727_s0] sm:$0xff]  ;;  %v30_v34 = vld [vmem:[%s727_s0 + $0x8] sm:$0xff]  ;;  %v31_v37 = vld [vmem:[%s727_s0 + $0x10] sm:$0xff] }
   0xe   :  { %121 = vmatpush.msra.mxu1 %v35_v18  ;;  %176 = vmatpush.msra.mxu2 %v430_v19  ;;  %v32_v40 = vld [vmem:[%s727_s0 + $0x18] sm:$0x3f]  ;;  %v276_v41 = vld [vmem:[%s729_s6 + $0x68] sm:$0xff]  ;;  %v275_v42 = vld [vmem:[%s729_s6 + $0x60] sm:$0xff] }
   0xf   :  { %81 = vmatpush.msra.mxu0 %v414_v20  ;;  %282 = vmatpush.msra.mxu3 %v276_v41  ;;  %v274_v43 = vld [vmem:[%s729_s6 + $0x58] sm:$0xff]  ;;  %v273_v44 = vld [vmem:[%s729_s6 + $0x50] sm:$0xff]  ;;  %v272_v45 = vld [vmem:[%s729_s6 + $0x48] sm:$0xff] }
  0x10   :  { %122 = vmatpush.msra.mxu1 %v34_v21  ;;  %177 = vmatpush.msra.mxu2 %v429_v23  ;;  %v271_v48 = vld [vmem:[%s729_s6 + $0x40] sm:$0xff]  ;;  %v270_v49 = vld [vmem:[%s729_s6 + $0x38] sm:$0xff]  ;;  %v269_v51 = vld [vmem:[%s729_s6 + $0x30] sm:$0xff] }
  0x11   :  { %82 = vmatpush.msra.mxu0 %v413_v24  ;;  %437 = vmatmul.msk.f32.vlgmr.msra.gmra.mxu2 %vm54_vm0, %v137_v26  ;;  %v268_v52 = vld [vmem:[%s729_s6 + $0x28] sm:$0xff]  ;;  %v267_v55 = vld [vmem:[%s729_s6 + $0x20] sm:$0xff]  ;;  %v266_v56 = vld [vmem:[%s729_s6 + $0x18] sm:$0xff] }
  0x12   :  { %123 = vmatpush.msra.mxu1 %v33_v27  ;;  %421 = vmatmul.msk.f32.vlgmr.msra.gmra.mxu0 %vm54_vm0, %v41_v28  ;;  %v265_v58 = vld [vmem:[%s729_s6 + $0x10] sm:$0xff]  ;;  %v264_v61 = vld [vmem:[%s729_s6 + $0x8] sm:$0xff]  ;;  %v263_v63 = vld [vmem:[%s729_s6] sm:$0xff] }
  0x13   :  { %425 = vmatmul.msk.f32.vlgmr.msra.gmra.mxu1 %vm54_vm0, %v29_v29  ;;  %214 = vperm.xlu0 %446, %v204_v30   ;;  %v448_v4 = vld [vmem:[%s728_s2] ss:$0 sm:$0xff] }
  0x14   :  { %224 = vperm.xlu1 %447, %v206_v31   ;;  %306 = vmatpush.msrb.mxu0 %v276_v41 }
  0x15   :  { %283 = vmatpush.msra.mxu3 %v275_v42 }
  0x16   :  { %307 = vmatpush.msrb.mxu0 %v275_v42 }
  0x17   :  { %284 = vmatpush.msra.mxu3 %v274_v43 }
  0x18   :  { %308 = vmatpush.msrb.mxu0 %v274_v43 }
  0x19   :  { %438 = vmatmul.msk.f32.gmra.mxu2 %vm54_vm0, %v138_v32  ;;  %285 = vmatpush.msra.mxu3 %v273_v44 }
  0x1a   :  { %422 = vmatmul.msk.f32.gmra.mxu0 %vm54_vm0, %v42_v33 }
  0x1b   :  { %426 = vmatmul.msk.f32.gmra.mxu1 %vm54_vm0, %v30_v34  ;;  %309 = vmatpush.msrb.mxu0 %v273_v44 }
  0x1c   :  { %286 = vmatpush.msra.mxu3 %v272_v45 }
  0x1d   :  { %310 = vmatpush.msrb.mxu0 %v272_v45 }
  0x1e   :  { %287 = vmatpush.msra.mxu3 %v271_v48 }
  0x1f   :  { %311 = vmatpush.msrb.mxu0 %v271_v48 }
  0x20   :  { %288 = vmatpush.msra.mxu3 %v270_v49 }
  0x21   :  { %439 = vmatmul.msk.f32.gmra.mxu2 %vm54_vm0, %v139_v35  ;;  %312 = vmatpush.msrb.mxu0 %v270_v49 }
  0x22   :  { %423 = vmatmul.msk.f32.gmra.mxu0 %vm54_vm0, %v43_v36  ;;  %289 = vmatpush.msra.mxu3 %v269_v51 }
  0x23   :  { %427 = vmatmul.msk.f32.gmra.mxu1 %vm54_vm0, %v31_v37  ;;  %313 = vmatpush.msrb.mxu0 %v269_v51 }
  0x24   :  { %290 = vmatpush.msra.mxu3 %v268_v52 }
  0x25   :  { %314 = vmatpush.msrb.mxu0 %v268_v52 }
  0x26   :  { %291 = vmatpush.msra.mxu3 %v267_v55 }
  0x27   :  { %315 = vmatpush.msrb.mxu0 %v267_v55 }
  0x28   :  { %292 = vmatpush.msra.mxu3 %v266_v56 }
  0x29   :  { %440 = vmatmul.msk.f32.gmra.mxu2 %vm54_vm0, %v140_v38  ;;  %316 = vmatpush.msrb.mxu0 %v266_v56 }
  0x2a   :  { %424 = vmatmul.msk.f32.gmra.mxu0 %vm54_vm0, %v44_v39  ;;  %293 = vmatpush.msra.mxu3 %v265_v58 }
  0x2b   :  { %428 = vmatmul.msk.f32.gmra.mxu1 %vm54_vm0, %v32_v40  ;;  %317 = vmatpush.msrb.mxu0 %v265_v58 }
  0x2c   :  { %294 = vmatpush.msra.mxu3 %v264_v61 }
  0x2d   :  { %318 = vmatpush.msrb.mxu0 %v264_v61 }
  0x2e   :  { %295 = vmatpush.msra.mxu3 %v263_v63 }
  0x2f   :  { %319 = vmatpush.msrb.mxu0 %v263_v63 }
  0x7b   :  { %v210_v57 = vpop.permute.xlu0 %209 }
  0x7d   :  { %v220_v11 = vpop.permute.xlu1 %219 }
  0x85   :  { %v215_v7 = vpop.permute.xlu0 %214 }
  0x86   :  { %v225_v30 = vpop.permute.xlu1 %224 }
  0x8f   :  { %v84_v46 = vpop.f32.mrf.mxu0 }
  0x90   :  { %v125_v47 = vpop.f32.mrf.mxu1 }
  0x91   :  { %v126_v62 = vadd.f32 %v125_v47, %v84_v46 }
  0x94   :  { %v179_v50 = vpop.f32.mrf.mxu2 }
  0x95   :  { %v191_v3 = vadd.f32 %v179_v50, %v126_v62 }
  0x97   :  { %v87_v53 = vpop.f32.mrf.mxu0  ;;  %v676_v9 = vadd.f32 %v448_v4, %v191_v3 }
  0x98   :  { %v128_v54 = vpop.f32.mrf.mxu1 }
  0x99   :  { %v129_v59 = vadd.f32 %v128_v54, %v87_v53  ;;  %v227_v16 = vmul.f32 %v210_v57, %v676_v9  ;;  %v343_v54 = vld [vmem:[%s730_s7] sm:$0xff] }
  0x9a   :  { %363 = vmatpush.msrb.mxu3 %v343_v54 }
  0x9b   :  { %v246_v21 = vmul.f32 %v227_v16, %v227_v16  ;;  %v232_v25 = vsel %vm231_vm1, %v227_v16, 0.0 }
  0x9c   :  { %v182_v60 = vpop.f32.mrf.mxu2 }
  0x9d   :  { %v192_v0 = vadd.f32 %v182_v60, %v129_v59  ;;  %v250_v31 = vsel %vm231_vm1, %v246_v21, 0.0 }
  0x9f   :  { %v90_v1 = vpop.f32.mrf.mxu0  ;;  %v674_v6 = vadd.f32 %v448_v4, %v192_v0 }
  0xa0   :  { %v131_v2 = vpop.f32.mrf.mxu1 }
  0xa1   :  { %v132_v5 = vadd.f32 %v131_v2, %v90_v1  ;;  %v228_v12 = vmul.f32 %v215_v7, %v674_v6 }
  0xa3   :  { %v247_v19 = vmul.f32 %v228_v12, %v228_v12  ;;  %v233_v22 = vsel %vm231_vm1, %v228_v12, 0.0 }
  0xa4   :  { %v185_v8 = vpop.f32.mrf.mxu2  ;;  %v234_v29 = vadd.f32 %v233_v22, %v232_v25 }
  0xa5   :  { %v193_v10 = vadd.f32 %v185_v8, %v132_v5  ;;  %v251_v26 = vsel %vm231_vm1, %v247_v19, 0.0 }
  0xa6   :  { %v252_v34 = vadd.f32 %v251_v26, %v250_v31 }
  0xa7   :  { %v679_v13 = vadd.f32 %v448_v4, %v193_v10  ;;  %v93_v14 = vpop.f32.mrf.mxu0  ;;  %v340_v10 = vld [vmem:[%s732_s4] sm:$0x1] }
  0xa8   :  { %v134_v15 = vpop.f32.mrf.mxu1 }
  0xa9   :  { %v229_v17 = vmul.f32 %v220_v11, %v679_v13  ;;  %v135_v18 = vadd.f32 %v134_v15, %v93_v14 }
  0xab   :  { %v248_v23 = vmul.f32 %v229_v17, %v229_v17  ;;  %v235_v27 = vsel %vm231_vm1, %v229_v17, 0.0 }
  0xac   :  { %v188_v20 = vpop.f32.mrf.mxu2  ;;  %v236_v35 = vadd.f32 %v235_v27, %v234_v29 }
  0xad   :  { %v194_v24 = vadd.f32 %v188_v20, %v135_v18  ;;  %v253_v32 = vsel %vm231_vm1, %v248_v23, 0.0 }
  0xae   :  { %v254_v38 = vadd.f32 %v253_v32, %v252_v34 }
  0xaf   :  { %v687_v28 = vadd.f32 %v448_v4, %v194_v24  ;;  %v338_v4 = vld [vmem:[%s731_s3] sm:$0x1] }
  0xb1   :  { %v230_v33 = vmul.f32 %v225_v30, %v687_v28 }
  0xb3   :  { %v238_v36 = vsel %vm237_vm2, %v230_v33, 0.0  ;;  %v249_v37 = vmul.f32 %v230_v33, %v230_v33 }
  0xb4   :  { %v239_v39 = vadd.f32 %v238_v36, %v236_v35 }
  0xb5   :  { %v255_v40 = vsel %vm237_vm2, %v249_v37, 0.0 }
  0xb6   :  { %v240_v41 = vrot.slane %v239_v39, 4  ;;  %v256_v42 = vadd.f32 %v255_v40, %v254_v38 }
  0xb8   :  { %v257_v43 = vrot.slane %v256_v42, 4  ;;  %v241_v44 = vadd.f32 %v240_v41, %v239_v39 }
  0xba   :  { %v242_v45 = vrot.slane %v241_v44, 2  ;;  %v258_v46 = vadd.f32 %v257_v43, %v256_v42 }
  0xbc   :  { %v243_v47 = vadd.f32 %v242_v45, %v241_v44  ;;  %v259_v48 = vrot.slane %v258_v46, 2 }
  0xbe   :  { %v244_v49 = vrot.slane %v243_v47, 1  ;;  %v260_v50 = vadd.f32 %v259_v48, %v258_v46 }
  0xc0   :  { %v245_v51 = vadd.f32 %v244_v49, %v243_v47  ;;  %v261_v52 = vrot.slane %v260_v50, 1 }
  0xc2   :  { %441 = vmatmul.msk.f32.vlgmr.msra.gmra.mxu3 %vm231_vm1, %v245_v51  ;;  %v262_v53 = vadd.f32 %v261_v52, %v260_v50 }
  0xc3   :  { %386 = vmatpush.msra.mxu3 %v343_v54 }
  0xc4   :  { %442 = vmatmul.msk.f32.vlgmr.msrb.gmra.mxu0 %vm231_vm1, %v262_v53 }
 0x141   :  { %v321_v55 = vpop.f32.mrf.mxu0 }
 0x142   :  { %v324_v58 = vmul.f32 0.0025510204, %v321_v55 }
 0x145   :  { %v297_v56 = vpop.f32.mrf.mxu3 }
 0x146   :  { %v300_v57 = vmul.f32 0.0025510204, %v297_v56 }
 0x148   :  { %v325_v59 = vmul.f32 %v300_v57, %v300_v57 }
 0x14a   :  { %v326_v60 = vsub.f32 %v324_v58, %v325_v59 }
 0x14c   :  { %v327_v61 = vadd.f32 1e-05, %v326_v60 }
 0x14e   :  { %449 = vrsqrt.f32 %v327_v61  ;;  %vm334_vm4 = vweird.f32 %v327_v61 }
 0x154   :  { %v450_v62 = vpop.eup %449 }
 0x155   :  { %v329_v63 = vmul.f32 %v450_v62, %v327_v61  ;;  %vm335_vm3 = vweird.f32 %v450_v62 }
 0x156   :  { %vm336_vm5 = vmor %vm334_vm4, %vm335_vm3 }
 0x157   :  { %v330_v0 = vmul.f32 %v450_v62, %v329_v63 }
 0x159   :  { %v331_v1 = vmul.f32 0.5, %v330_v0 }
 0x15b   :  { %v332_v2 = vsub.f32 1.5, %v331_v1 }
 0x15d   :  { %v333_v3 = vmul.f32 %v450_v62, %v332_v2 }
 0x15f   :  { %v337_v5 = vsel %vm336_vm5, %v450_v62, %v333_v3 }
 0x160   :  { %v339_v7 = vmul.f32 %v338_v4, %v337_v5 }
 0x162   :  { %443 = vmatmul.msk.f32.vlgmr.msrb.gmra.mxu3 %vm344_vm6, %v339_v7  ;;  %v341_v8 = vmul.f32 %v339_v7, %v300_v57 }
 0x164   :  { %v342_v11 = vsub.f32 %v340_v10, %v341_v8 }
 0x16a   :  { %444 = vmatmul.msk.f32.vlgmr.msra.gmra.mxu3 %vm344_vm6, %v342_v11 }
 0x1e5   :  { %v365_v12 = vpop.f32.mrf.mxu3 }
 0x1e6   :  { %v391_v14 = vperm.slane %v365_v12, 0 }
 0x1e8   :  { %v392_v15 = vmul.f32 %v391_v14, %v676_v9  ;;  %v393_v17 = vmul.f32 %v391_v14, %v674_v6  ;;  %v394_v18 = vmul.f32 %v391_v14, %v679_v13  ;;  %v395_v19 = vmul.f32 %v391_v14, %v687_v28 }
 0x1ed   :  { %v388_v16 = vpop.f32.mrf.mxu3 }
 0x1ee   :  { %v396_v20 = vperm.slane %v388_v16, 0 }
 0x1f0   :  { %v397_v21 = vadd.f32 %v396_v20, %v392_v15  ;;  %v398_v22 = vadd.f32 %v396_v20, %v393_v17  ;;  %v399_v23 = vadd.f32 %v396_v20, %v394_v18  ;;  %v400_v24 = vadd.f32 %v396_v20, %v395_v19 }
 0x1f2   :  { %v401_v25 = vmax.f32 %v397_v21, 0.0  ;;  %v402_v26 = vmax.f32 %v398_v22, 0.0  ;;  %v403_v27 = vmax.f32 %v399_v23, 0.0  ;;  %v404_v29 = vmax.f32 %v400_v24, 0.0 }
 0x1f4   :  { %405 = vst.msk [vmem:[%s733_s8] sm:$0xff] %vm231_vm1, %v401_v25 }
 0x1f5   :  { %406 = vst.msk [vmem:[%s733_s8 + $0x8] sm:$0xff] %vm231_vm1, %v402_v26 }
 0x1f6   :  { %407 = vst.msk [vmem:[%s733_s8 + $0x10] sm:$0xff] %vm231_vm1, %v403_v27 }
 0x1f7   :  { %408 = vst.msk [vmem:[%s733_s8 + $0x18] sm:$0x3f] %vm237_vm2, %v404_v29 }

</bundles_post_ra>
